<compile_context>
chip_gen: v5e
topology: v5e:2x2
jax: 0.10.0
libtpu: 0.0.40
codegen_flags: <defaults>
</compile_context>

<pallas_src>
import jax
import jax.numpy as jnp
from jax.experimental import pallas as pl
from jax.experimental.pallas import tpu as pltpu

KSIZE = 3                 # conv kernel size (padding = KSIZE // 2, bias=False)
KS2 = KSIZE * KSIZE
_PAD = KSIZE // 2
_LANES = 128


# --------------------------------------------------------------------------- kernel

def _make_kernel(W, chunk, multi_c):
    """Build the kernel body. `chunk` = channel rows reduced per fori_loop step."""

    def channel_stats(x_ref):
        # Fused single pass over this channel tile: running sum + running max.
        nb, tc, _ = x_ref.shape

        def reduce_slice(start, size):
            blk = x_ref[:, pl.ds(start, size), :].astype(jnp.float32)
            return jnp.sum(blk, axis=1), jnp.max(blk, axis=1)

        n_full = tc // chunk
        rem = tc - n_full * chunk
        if n_full == 0:
            return reduce_slice(0, rem)
        s, m = reduce_slice(0, chunk)
        if n_full > 1:
            def body(i, carry):
                cs, cm = reduce_slice(pl.multiple_of(i * chunk, chunk), chunk)
                return carry[0] + cs, jnp.maximum(carry[1], cm)
            s, m = jax.lax.fori_loop(1, n_full, body, (s, m),
                                     unroll=min(4, n_full - 1))
        if rem:
            cs, cm = reduce_slice(n_full * chunk, rem)
            s, m = s + cs, jnp.maximum(m, cm)
        return s, m

    def conv_sigmoid(wmask_ref, s_tot, m_tot):
        # 3x3 SAME conv via flat-spatial rolls; weights*validity come from wmask_ref.
        nb, hwp = s_tot.shape
        sm = jnp.stack([s_tot, m_tot], axis=0)            # (2, nb, HWp): 1 roll per tap
        acc = jnp.zeros((nb, hwp), jnp.float32)
        t = 0
        for kh in range(KSIZE):
            for kw in range(KSIZE):
                d = (kh - _PAD) * W + (kw - _PAD)          # source offset for this tap
                r = sm if d == 0 else jnp.roll(sm, -d, axis=2)
                wa = wmask_ref[t:t + 1, :]                 # (1, HWp) avg weight (has 1/C) * mask
                wm = wmask_ref[KS2 + t:KS2 + t + 1, :]     # (1, HWp) max weight * mask
                acc = acc + r[0] * wa + r[1] * wm
                t += 1
        return 1.0 / (1.0 + jnp.exp(-acc))                 # exact f32 sigmoid

    if multi_c:
        def kernel(wmask_ref, x_ref, o_ref, sum_ref, max_ref):
            c_blk = pl.program_id(1)
            s, m = channel_stats(x_ref)

            @pl.when(c_blk == 0)
            def _():
                sum_ref[...] = s
                max_ref[...] = m

            @pl.when(c_blk != 0)
            def _():
                sum_ref[...] = sum_ref[...] + s
                max_ref[...] = jnp.maximum(max_ref[...], m)

            @pl.when(c_blk == pl.num_programs(1) - 1)
            def _():
                sig = conv_sigmoid(wmask_ref, sum_ref[...], max_ref[...])
                o_ref[:, 0, :] = sig.astype(o_ref.dtype)
    else:
        def kernel(wmask_ref, x_ref, o_ref):
            s, m = channel_stats(x_ref)
            sig = conv_sigmoid(wmask_ref, s, m)
            o_ref[:, 0, :] = sig.astype(o_ref.dtype)

    return kernel


# --------------------------------------------------------------------------- wrapper

def _vmem_capacity_bytes():
    try:
        return int(pltpu.get_tpu_info().vmem_capacity_bytes)
    except Exception:
        return 64 * (1 << 20)   # conservative fallback (v7x per-TC VMEM)


def _pick_tiles(N, C, HWp, itemsize, budget_bytes, chunk):
    """Pick (nb, tc) so the double-buffered input block fits budget_bytes."""
    blk = lambda d, t: 2 * d * t * HWp * itemsize
    divs = [d for d in range(1, N + 1) if N % d == 0]
    fits = [d for d in divs if blk(d, C) <= budget_bytes]
    if fits:
        mult8 = [d for d in fits if d % 8 == 0]          # full sublanes for (nb, HW) work
        # TODO(synk): on v7x (2 TCs) keep >=2 batch steps so the "parallel" axis can be
        # core-sharded; single-TC v5e/v6e prefer the biggest block (per review).
        return (max(mult8) if mult8 else max(fits)), C
    # Whole channel axis does not fit even for one batch row: tile C (nb = 1).
    cdivs = [t for t in range(1, C + 1) if C % t == 0 and blk(1, t) <= budget_bytes]
    if not cdivs:
        small8 = [t for t in range(8, C + 1, 8) if C % t == 0]
        # TODO(synk): masked partial channel tiles for extreme C*HW feature maps.
        return 1, (min(small8) if small8 else 1)
    pref = ([t for t in cdivs if t % chunk == 0]
            or [t for t in cdivs if t % 8 == 0]
            or cdivs)
    return 1, max(pref)


def _build_weight_masks(conv_w, C, H, W, HWp):
    """(2*KS2, HWp) f32: per-tap conv weight x SAME-zero-padding validity mask.

    Row t (t = kh*KSIZE + kw)  -> avg-branch weight (already divided by C).
    Row KS2 + t                -> max-branch weight.
    """
    HW = H * W
    w_avg = (conv_w[0, 0].astype(jnp.float32) / C).reshape(-1)   # fold 1/C of the mean
    w_max = conv_w[0, 1].astype(jnp.float32).reshape(-1)
    pos = jnp.arange(HWp, dtype=jnp.int32)
    row = pos // W
    col = pos % W
    real = pos < HW                                              # lane-padding positions
    masks = []
    for kh in range(KSIZE):
        for kw in range(KSIZE):
            sh, sw = kh - _PAD, kw - _PAD
            valid = real
            if sh < 0:
                valid = valid & (row >= -sh)
            if sh > 0:
                valid = valid & (row < H - sh)
            if sw < 0:
                valid = valid & (col >= -sw)
            if sw > 0:
                valid = valid & (col < W - sw)
            masks.append(valid)
    vm = jnp.stack(masks).astype(jnp.float32)                    # (KS2, HWp)
    return jnp.concatenate([w_avg[:, None] * vm, w_max[:, None] * vm], axis=0)


def spatial_attention(x, conv_w, *, vmem_block_budget_bytes=None, compute_dtype=None):
    """x: (N, C, H, W); conv_w: (1, 2, KSIZE, KSIZE), bias-free. Returns (N, 1, H, W) f32."""
    N, C, H, W = x.shape
    assert conv_w.shape == (1, 2, KSIZE, KSIZE)
    HW = H * W
    HWp = max(_LANES, ((HW + _LANES - 1) // _LANES) * _LANES)    # lane-dense spatial axis

    if compute_dtype is not None and x.dtype != compute_dtype:
        x = x.astype(compute_dtype)          # e.g. bf16: halves HBM traffic, f32 accum inside
    itemsize = jnp.dtype(x.dtype).itemsize
    chunk = 8 * max(1, 4 // itemsize)        # sublane rows per reduce step (f32:8 bf16:16 i8:32)

    x_flat = x.reshape(N, C, HW)             # free reshape of contiguous NCHW
    if HWp != HW:
        x_flat = jnp.pad(x_flat, ((0, 0), (0, 0), (0, HWp - HW)))

    wmask = _build_weight_masks(conv_w, C, H, W, HWp)            # (18, HWp) f32

    cap = _vmem_capacity_bytes()
    if vmem_block_budget_bytes is None:
        vmem_block_budget_bytes = cap // 4   # double-buffered input-block budget
    nb, tc = _pick_tiles(N, C, HWp, itemsize, vmem_block_budget_bytes, chunk)
    n_steps, c_steps = N // nb, C // tc
    multi_c = c_steps > 1

    in_blk = nb * tc * HWp * itemsize
    needed = (2 * in_blk + 4 * nb * HWp * 4 + 2 * nb * HWp * 4
              + 2 * KS2 * HWp * 4 + (1 << 20))
    vmem_limit = int(min(cap, max(needed, cap - 8 * (1 << 20))))

    x_index_map = lambda n, c: (n, c, 0)
    try:
        deep = in_blk < (2 << 20) and n_steps * c_steps >= 3
        x_spec = (pl.BlockSpec((nb, tc, HWp), x_index_map, pipeline_mode=pl.Buffered(3))
                  if deep else pl.BlockSpec((nb, tc, HWp), x_index_map))
    except Exception:  # pl.Buffered / pipeline_mode unavailable on this JAX version
        x_spec = pl.BlockSpec((nb, tc, HWp), x_index_map)

    scratch = ([pltpu.VMEM((nb, HWp), jnp.float32),
                pltpu.VMEM((nb, HWp), jnp.float32)] if multi_c else [])

    cost = pl.CostEstimate(
        flops=2 * N * C * HW + 5 * KS2 * N * HW,
        transcendentals=N * HW,
        bytes_accessed=N * C * HWp * itemsize + N * HWp * 4 + 2 * KS2 * HWp * 4)

    out = pl.pallas_call(
        _make_kernel(W, chunk, multi_c),
        out_shape=jax.ShapeDtypeStruct((N, 1, HWp), jnp.float32),
        grid=(n_steps, c_steps),
        in_specs=[pl.BlockSpec((2 * KS2, HWp), lambda n, c: (0, 0)),   # weight*mask table
                  x_spec],                                             # input channel tile
        out_specs=pl.BlockSpec((nb, 1, HWp), lambda n, c: (n, 0, 0)),
        scratch_shapes=scratch,
        compiler_params=pltpu.CompilerParams(
            dimension_semantics=("parallel", "arbitrary"),
            vmem_limit_bytes=vmem_limit),
        cost_estimate=cost,
    )(wmask, x_flat)

    if HWp != HW:
        out = out[:, :, :HW]
    return out.reshape(N, 1, H, W)


# --------------------------------------------------------------------------- reference

def _reference(x, conv_w):
    """Pure-JAX mirror of the PyTorch forward (exact f32)."""
    avg_out = jnp.mean(x, axis=1, keepdims=True)
    max_out = jnp.max(x, axis=1, keepdims=True)
    feat = jnp.concatenate([avg_out, max_out], axis=1)               # (N, 2, H, W)
    out = jax.lax.conv_general_dilated(
        feat, conv_w.astype(jnp.float32), window_strides=(1, 1), padding="SAME",
        dimension_numbers=("NCHW", "OIHW", "NCHW"),
        precision=jax.lax.Precision.HIGHEST)
    return jax.nn.sigmoid(out)


def _init_weight(key):
    fan_in = 2 * KS2
    bound = (1.0 / fan_in) ** 0.5
    return jax.random.uniform(key, (1, 2, KSIZE, KSIZE),
                              minval=-bound, maxval=bound, dtype=jnp.float32)


if __name__ == "__main__":
    key = jax.random.PRNGKey(0)
    kx1, kx2, kx3, kw = jax.random.split(key, 4)
    conv_w = _init_weight(kw)

    checks = [
        # (shape, forced block budget) -- None = generation-aware default
        ((2, 4, 16, 16), None, kx1),     # whole-C, single-step fast path
        ((2, 32, 16, 16), 40_000, kx2),  # forces nb=1, tc=16: channel-tiled accumulation path
        ((2, 4, 7, 7), None, kx3),       # HW=49 -> lane padding to 128
    ]
    for shape, budget, k in checks:
        x = jax.random.normal(k, shape, dtype=jnp.float32)
        out = jax.block_until_ready(
            spatial_attention(x, conv_w, vmem_block_budget_bytes=budget))
        ref = _reference(x, conv_w)
        assert out.shape == (shape[0], 1, shape[2], shape[3])
        err = float(jnp.max(jnp.abs(out - ref)))
        assert jnp.allclose(out, ref, atol=1e-4, rtol=1e-4), (
            f"mismatch vs reference for shape {shape}: max_abs_err={err}")

    print("KERNEL_OK")
</pallas_src>

<mosaic_0001>
module attributes {stable_mosaic.version = 11 : i64} {
  func.func @kernel(%arg0: i32, %arg1: i32, %arg2: memref<18x256xf32, #tpu.memory_space<vmem>>, %arg3: memref<2x4x256xf32, #tpu.memory_space<vmem>>, %arg4: memref<2x1x256xf32, #tpu.memory_space<vmem>>) attributes {dimension_semantics = [#tpu.dimension_semantics<parallel>, #tpu.dimension_semantics<arbitrary>], iteration_bounds = array<i64: 1, 1>, scalar_prefetch = 0 : i64, scratch_operands = 0 : i64, tpu.core_type = #tpu.core_type<tc>, window_params = [{pipeline_mode = #tpu.pipeline_mode<synchronous>, transform_indices = @transform_0, window_bounds = array<i64: 18, 256>}, {transform_indices = @transform_1, window_bounds = array<i64: 2, 4, 256>}, {transform_indices = @transform_2, window_bounds = array<i64: 2, 1, 256>}]} {
    %c0 = arith.constant 0 : index
    %c0_0 = arith.constant 0 : index
    %c0_1 = arith.constant 0 : index
    %0 = vector.load %arg3[%c0, %c0_0, %c0_1] : memref<2x4x256xf32, #tpu.memory_space<vmem>>, vector<2x4x256xf32>
    %cst = arith.constant dense<0.000000e+00> : vector<2x256xf32>
    %1 = vector.multi_reduction <add>, %0, %cst [1] : vector<2x4x256xf32> to vector<2x256xf32>
    %cst_2 = arith.constant dense<0xFF800000> : vector<2x256xf32>
    %2 = vector.multi_reduction <maximumf>, %0, %cst_2 [1] : vector<2x4x256xf32> to vector<2x256xf32>
    %3 = vector.shape_cast %1 : vector<2x256xf32> to vector<1x2x256xf32>
    %4 = vector.shape_cast %2 : vector<2x256xf32> to vector<1x2x256xf32>
    %5 = tpu.concatenate %3, %4 in 0 : vector<1x2x256xf32>, vector<1x2x256xf32> -> vector<2x2x256xf32>
    %cst_3 = arith.constant 0.000000e+00 : f32
    %6 = vector.broadcast %cst_3 : f32 to vector<2x256xf32>
    %7 = vector.extract_strided_slice %5 {offsets = [0, 0, 239], sizes = [2, 2, 17], strides = [1, 1, 1]} : vector<2x2x256xf32> to vector<2x2x17xf32>
    %8 = vector.extract_strided_slice %5 {offsets = [0, 0, 0], sizes = [2, 2, 239], strides = [1, 1, 1]} : vector<2x2x256xf32> to vector<2x2x239xf32>
    %9 = tpu.concatenate %7, %8 in 2 : vector<2x2x17xf32>, vector<2x2x239xf32> -> vector<2x2x256xf32>
    %c0_4 = arith.constant 0 : index
    %c0_5 = arith.constant 0 : index
    %10 = vector.load %arg2[%c0_4, %c0_5] : memref<18x256xf32, #tpu.memory_space<vmem>>, vector<1x256xf32>
    %c9 = arith.constant 9 : index
    %c0_6 = arith.constant 0 : index
    %11 = vector.load %arg2[%c9, %c0_6] : memref<18x256xf32, #tpu.memory_space<vmem>>, vector<1x256xf32>
    %12 = vector.extract_strided_slice %9 {offsets = [0, 0, 0], sizes = [1, 2, 256], strides = [1, 1, 1]} : vector<2x2x256xf32> to vector<1x2x256xf32>
    %13 = vector.shape_cast %12 : vector<1x2x256xf32> to vector<2x256xf32>
    %14 = vector.broadcast %10 : vector<1x256xf32> to vector<2x256xf32>
    %15 = arith.mulf %13, %14 : vector<2x256xf32>
    %16 = arith.addf %6, %15 : vector<2x256xf32>
    %17 = vector.extract_strided_slice %9 {offsets = [1, 0, 0], sizes = [1, 2, 256], strides = [1, 1, 1]} : vector<2x2x256xf32> to vector<1x2x256xf32>
    %18 = vector.shape_cast %17 : vector<1x2x256xf32> to vector<2x256xf32>
    %19 = vector.broadcast %11 : vector<1x256xf32> to vector<2x256xf32>
    %20 = arith.mulf %18, %19 : vector<2x256xf32>
    %21 = arith.addf %16, %20 : vector<2x256xf32>
    %22 = vector.extract_strided_slice %5 {offsets = [0, 0, 240], sizes = [2, 2, 16], strides = [1, 1, 1]} : vector<2x2x256xf32> to vector<2x2x16xf32>
    %23 = vector.extract_strided_slice %5 {offsets = [0, 0, 0], sizes = [2, 2, 240], strides = [1, 1, 1]} : vector<2x2x256xf32> to vector<2x2x240xf32>
    %24 = tpu.concatenate %22, %23 in 2 : vector<2x2x16xf32>, vector<2x2x240xf32> -> vector<2x2x256xf32>
    %c1 = arith.constant 1 : index
    %c0_7 = arith.constant 0 : index
    %25 = vector.load %arg2[%c1, %c0_7] : memref<18x256xf32, #tpu.memory_space<vmem>>, vector<1x256xf32>
    %c10 = arith.constant 10 : index
    %c0_8 = arith.constant 0 : index
    %26 = vector.load %arg2[%c10, %c0_8] : memref<18x256xf32, #tpu.memory_space<vmem>>, vector<1x256xf32>
    %27 = vector.extract_strided_slice %24 {offsets = [0, 0, 0], sizes = [1, 2, 256], strides = [1, 1, 1]} : vector<2x2x256xf32> to vector<1x2x256xf32>
    %28 = vector.shape_cast %27 : vector<1x2x256xf32> to vector<2x256xf32>
    %29 = vector.broadcast %25 : vector<1x256xf32> to vector<2x256xf32>
    %30 = arith.mulf %28, %29 : vector<2x256xf32>
    %31 = arith.addf %21, %30 : vector<2x256xf32>
    %32 = vector.extract_strided_slice %24 {offsets = [1, 0, 0], sizes = [1, 2, 256], strides = [1, 1, 1]} : vector<2x2x256xf32> to vector<1x2x256xf32>
    %33 = vector.shape_cast %32 : vector<1x2x256xf32> to vector<2x256xf32>
    %34 = vector.broadcast %26 : vector<1x256xf32> to vector<2x256xf32>
    %35 = arith.mulf %33, %34 : vector<2x256xf32>
    %36 = arith.addf %31, %35 : vector<2x256xf32>
    %37 = vector.extract_strided_slice %5 {offsets = [0, 0, 241], sizes = [2, 2, 15], strides = [1, 1, 1]} : vector<2x2x256xf32> to vector<2x2x15xf32>
    %38 = vector.extract_strided_slice %5 {offsets = [0, 0, 0], sizes = [2, 2, 241], strides = [1, 1, 1]} : vector<2x2x256xf32> to vector<2x2x241xf32>
    %39 = tpu.concatenate %37, %38 in 2 : vector<2x2x15xf32>, vector<2x2x241xf32> -> vector<2x2x256xf32>
    %c2 = arith.constant 2 : index
    %c0_9 = arith.constant 0 : index
    %40 = vector.load %arg2[%c2, %c0_9] : memref<18x256xf32, #tpu.memory_space<vmem>>, vector<1x256xf32>
    %c11 = arith.constant 11 : index
    %c0_10 = arith.constant 0 : index
    %41 = vector.load %arg2[%c11, %c0_10] : memref<18x256xf32, #tpu.memory_space<vmem>>, vector<1x256xf32>
    %42 = vector.extract_strided_slice %39 {offsets = [0, 0, 0], sizes = [1, 2, 256], strides = [1, 1, 1]} : vector<2x2x256xf32> to vector<1x2x256xf32>
    %43 = vector.shape_cast %42 : vector<1x2x256xf32> to vector<2x256xf32>
    %44 = vector.broadcast %40 : vector<1x256xf32> to vector<2x256xf32>
    %45 = arith.mulf %43, %44 : vector<2x256xf32>
    %46 = arith.addf %36, %45 : vector<2x256xf32>
    %47 = vector.extract_strided_slice %39 {offsets = [1, 0, 0], sizes = [1, 2, 256], strides = [1, 1, 1]} : vector<2x2x256xf32> to vector<1x2x256xf32>
    %48 = vector.shape_cast %47 : vector<1x2x256xf32> to vector<2x256xf32>
    %49 = vector.broadcast %41 : vector<1x256xf32> to vector<2x256xf32>
    %50 = arith.mulf %48, %49 : vector<2x256xf32>
    %51 = arith.addf %46, %50 : vector<2x256xf32>
    %52 = vector.extract_strided_slice %5 {offsets = [0, 0, 255], sizes = [2, 2, 1], strides = [1, 1, 1]} : vector<2x2x256xf32> to vector<2x2x1xf32>
    %53 = vector.extract_strided_slice %5 {offsets = [0, 0, 0], sizes = [2, 2, 255], strides = [1, 1, 1]} : vector<2x2x256xf32> to vector<2x2x255xf32>
    %54 = tpu.concatenate %52, %53 in 2 : vector<2x2x1xf32>, vector<2x2x255xf32> -> vector<2x2x256xf32>
    %c3 = arith.constant 3 : index
    %c0_11 = arith.constant 0 : index
    %55 = vector.load %arg2[%c3, %c0_11] : memref<18x256xf32, #tpu.memory_space<vmem>>, vector<1x256xf32>
    %c12 = arith.constant 12 : index
    %c0_12 = arith.constant 0 : index
    %56 = vector.load %arg2[%c12, %c0_12] : memref<18x256xf32, #tpu.memory_space<vmem>>, vector<1x256xf32>
    %57 = vector.extract_strided_slice %54 {offsets = [0, 0, 0], sizes = [1, 2, 256], strides = [1, 1, 1]} : vector<2x2x256xf32> to vector<1x2x256xf32>
    %58 = vector.shape_cast %57 : vector<1x2x256xf32> to vector<2x256xf32>
    %59 = vector.broadcast %55 : vector<1x256xf32> to vector<2x256xf32>
    %60 = arith.mulf %58, %59 : vector<2x256xf32>
    %61 = arith.addf %51, %60 : vector<2x256xf32>
    %62 = vector.extract_strided_slice %54 {offsets = [1, 0, 0], sizes = [1, 2, 256], strides = [1, 1, 1]} : vector<2x2x256xf32> to vector<1x2x256xf32>
    %63 = vector.shape_cast %62 : vector<1x2x256xf32> to vector<2x256xf32>
    %64 = vector.broadcast %56 : vector<1x256xf32> to vector<2x256xf32>
    %65 = arith.mulf %63, %64 : vector<2x256xf32>
    %66 = arith.addf %61, %65 : vector<2x256xf32>
    %c4 = arith.constant 4 : index
    %c0_13 = arith.constant 0 : index
    %67 = vector.load %arg2[%c4, %c0_13] : memref<18x256xf32, #tpu.memory_space<vmem>>, vector<1x256xf32>
    %c13 = arith.constant 13 : index
    %c0_14 = arith.constant 0 : index
    %68 = vector.load %arg2[%c13, %c0_14] : memref<18x256xf32, #tpu.memory_space<vmem>>, vector<1x256xf32>
    %69 = vector.extract_strided_slice %5 {offsets = [0, 0, 0], sizes = [1, 2, 256], strides = [1, 1, 1]} : vector<2x2x256xf32> to vector<1x2x256xf32>
    %70 = vector.shape_cast %69 : vector<1x2x256xf32> to vector<2x256xf32>
    %71 = vector.broadcast %67 : vector<1x256xf32> to vector<2x256xf32>
    %72 = arith.mulf %70, %71 : vector<2x256xf32>
    %73 = arith.addf %66, %72 : vector<2x256xf32>
    %74 = vector.extract_strided_slice %5 {offsets = [1, 0, 0], sizes = [1, 2, 256], strides = [1, 1, 1]} : vector<2x2x256xf32> to vector<1x2x256xf32>
    %75 = vector.shape_cast %74 : vector<1x2x256xf32> to vector<2x256xf32>
    %76 = vector.broadcast %68 : vector<1x256xf32> to vector<2x256xf32>
    %77 = arith.mulf %75, %76 : vector<2x256xf32>
    %78 = arith.addf %73, %77 : vector<2x256xf32>
    %79 = vector.extract_strided_slice %5 {offsets = [0, 0, 1], sizes = [2, 2, 255], strides = [1, 1, 1]} : vector<2x2x256xf32> to vector<2x2x255xf32>
    %80 = vector.extract_strided_slice %5 {offsets = [0, 0, 0], sizes = [2, 2, 1], strides = [1, 1, 1]} : vector<2x2x256xf32> to vector<2x2x1xf32>
    %81 = tpu.concatenate %79, %80 in 2 : vector<2x2x255xf32>, vector<2x2x1xf32> -> vector<2x2x256xf32>
    %c5 = arith.constant 5 : index
    %c0_15 = arith.constant 0 : index
    %82 = vector.load %arg2[%c5, %c0_15] : memref<18x256xf32, #tpu.memory_space<vmem>>, vector<1x256xf32>
    %c14 = arith.constant 14 : index
    %c0_16 = arith.constant 0 : index
    %83 = vector.load %arg2[%c14, %c0_16] : memref<18x256xf32, #tpu.memory_space<vmem>>, vector<1x256xf32>
    %84 = vector.extract_strided_slice %81 {offsets = [0, 0, 0], sizes = [1, 2, 256], strides = [1, 1, 1]} : vector<2x2x256xf32> to vector<1x2x256xf32>
    %85 = vector.shape_cast %84 : vector<1x2x256xf32> to vector<2x256xf32>
    %86 = vector.broadcast %82 : vector<1x256xf32> to vector<2x256xf32>
    %87 = arith.mulf %85, %86 : vector<2x256xf32>
    %88 = arith.addf %78, %87 : vector<2x256xf32>
    %89 = vector.extract_strided_slice %81 {offsets = [1, 0, 0], sizes = [1, 2, 256], strides = [1, 1, 1]} : vector<2x2x256xf32> to vector<1x2x256xf32>
    %90 = vector.shape_cast %89 : vector<1x2x256xf32> to vector<2x256xf32>
    %91 = vector.broadcast %83 : vector<1x256xf32> to vector<2x256xf32>
    %92 = arith.mulf %90, %91 : vector<2x256xf32>
    %93 = arith.addf %88, %92 : vector<2x256xf32>
    %94 = vector.extract_strided_slice %5 {offsets = [0, 0, 15], sizes = [2, 2, 241], strides = [1, 1, 1]} : vector<2x2x256xf32> to vector<2x2x241xf32>
    %95 = vector.extract_strided_slice %5 {offsets = [0, 0, 0], sizes = [2, 2, 15], strides = [1, 1, 1]} : vector<2x2x256xf32> to vector<2x2x15xf32>
    %96 = tpu.concatenate %94, %95 in 2 : vector<2x2x241xf32>, vector<2x2x15xf32> -> vector<2x2x256xf32>
    %c6 = arith.constant 6 : index
    %c0_17 = arith.constant 0 : index
    %97 = vector.load %arg2[%c6, %c0_17] : memref<18x256xf32, #tpu.memory_space<vmem>>, vector<1x256xf32>
    %c15 = arith.constant 15 : index
    %c0_18 = arith.constant 0 : index
    %98 = vector.load %arg2[%c15, %c0_18] : memref<18x256xf32, #tpu.memory_space<vmem>>, vector<1x256xf32>
    %99 = vector.extract_strided_slice %96 {offsets = [0, 0, 0], sizes = [1, 2, 256], strides = [1, 1, 1]} : vector<2x2x256xf32> to vector<1x2x256xf32>
    %100 = vector.shape_cast %99 : vector<1x2x256xf32> to vector<2x256xf32>
    %101 = vector.broadcast %97 : vector<1x256xf32> to vector<2x256xf32>
    %102 = arith.mulf %100, %101 : vector<2x256xf32>
    %103 = arith.addf %93, %102 : vector<2x256xf32>
    %104 = vector.extract_strided_slice %96 {offsets = [1, 0, 0], sizes = [1, 2, 256], strides = [1, 1, 1]} : vector<2x2x256xf32> to vector<1x2x256xf32>
    %105 = vector.shape_cast %104 : vector<1x2x256xf32> to vector<2x256xf32>
    %106 = vector.broadcast %98 : vector<1x256xf32> to vector<2x256xf32>
    %107 = arith.mulf %105, %106 : vector<2x256xf32>
    %108 = arith.addf %103, %107 : vector<2x256xf32>
    %109 = vector.extract_strided_slice %5 {offsets = [0, 0, 16], sizes = [2, 2, 240], strides = [1, 1, 1]} : vector<2x2x256xf32> to vector<2x2x240xf32>
    %110 = vector.extract_strided_slice %5 {offsets = [0, 0, 0], sizes = [2, 2, 16], strides = [1, 1, 1]} : vector<2x2x256xf32> to vector<2x2x16xf32>
    %111 = tpu.concatenate %109, %110 in 2 : vector<2x2x240xf32>, vector<2x2x16xf32> -> vector<2x2x256xf32>
    %c7 = arith.constant 7 : index
    %c0_19 = arith.constant 0 : index
    %112 = vector.load %arg2[%c7, %c0_19] : memref<18x256xf32, #tpu.memory_space<vmem>>, vector<1x256xf32>
    %c16 = arith.constant 16 : index
    %c0_20 = arith.constant 0 : index
    %113 = vector.load %arg2[%c16, %c0_20] : memref<18x256xf32, #tpu.memory_space<vmem>>, vector<1x256xf32>
    %114 = vector.extract_strided_slice %111 {offsets = [0, 0, 0], sizes = [1, 2, 256], strides = [1, 1, 1]} : vector<2x2x256xf32> to vector<1x2x256xf32>
    %115 = vector.shape_cast %114 : vector<1x2x256xf32> to vector<2x256xf32>
    %116 = vector.broadcast %112 : vector<1x256xf32> to vector<2x256xf32>
    %117 = arith.mulf %115, %116 : vector<2x256xf32>
    %118 = arith.addf %108, %117 : vector<2x256xf32>
    %119 = vector.extract_strided_slice %111 {offsets = [1, 0, 0], sizes = [1, 2, 256], strides = [1, 1, 1]} : vector<2x2x256xf32> to vector<1x2x256xf32>
    %120 = vector.shape_cast %119 : vector<1x2x256xf32> to vector<2x256xf32>
    %121 = vector.broadcast %113 : vector<1x256xf32> to vector<2x256xf32>
    %122 = arith.mulf %120, %121 : vector<2x256xf32>
    %123 = arith.addf %118, %122 : vector<2x256xf32>
    %124 = vector.extract_strided_slice %5 {offsets = [0, 0, 17], sizes = [2, 2, 239], strides = [1, 1, 1]} : vector<2x2x256xf32> to vector<2x2x239xf32>
    %125 = vector.extract_strided_slice %5 {offsets = [0, 0, 0], sizes = [2, 2, 17], strides = [1, 1, 1]} : vector<2x2x256xf32> to vector<2x2x17xf32>
    %126 = tpu.concatenate %124, %125 in 2 : vector<2x2x239xf32>, vector<2x2x17xf32> -> vector<2x2x256xf32>
    %c8 = arith.constant 8 : index
    %c0_21 = arith.constant 0 : index
    %127 = vector.load %arg2[%c8, %c0_21] : memref<18x256xf32, #tpu.memory_space<vmem>>, vector<1x256xf32>
    %c17 = arith.constant 17 : index
    %c0_22 = arith.constant 0 : index
    %128 = vector.load %arg2[%c17, %c0_22] : memref<18x256xf32, #tpu.memory_space<vmem>>, vector<1x256xf32>
    %129 = vector.extract_strided_slice %126 {offsets = [0, 0, 0], sizes = [1, 2, 256], strides = [1, 1, 1]} : vector<2x2x256xf32> to vector<1x2x256xf32>
    %130 = vector.shape_cast %129 : vector<1x2x256xf32> to vector<2x256xf32>
    %131 = vector.broadcast %127 : vector<1x256xf32> to vector<2x256xf32>
    %132 = arith.mulf %130, %131 : vector<2x256xf32>
    %133 = arith.addf %123, %132 : vector<2x256xf32>
    %134 = vector.extract_strided_slice %126 {offsets = [1, 0, 0], sizes = [1, 2, 256], strides = [1, 1, 1]} : vector<2x2x256xf32> to vector<1x2x256xf32>
    %135 = vector.shape_cast %134 : vector<1x2x256xf32> to vector<2x256xf32>
    %136 = vector.broadcast %128 : vector<1x256xf32> to vector<2x256xf32>
    %137 = arith.mulf %135, %136 : vector<2x256xf32>
    %138 = arith.addf %133, %137 : vector<2x256xf32>
    %cst_23 = arith.constant 0.000000e+00 : f32
    %139 = vector.broadcast %cst_23 : f32 to vector<2x256xf32>
    %140 = arith.subf %139, %138 : vector<2x256xf32>
    %141 = math.exp %140 : vector<2x256xf32>
    %cst_24 = arith.constant 1.000000e+00 : f32
    %142 = vector.broadcast %cst_24 : f32 to vector<2x256xf32>
    %143 = arith.addf %142, %141 : vector<2x256xf32>
    %cst_25 = arith.constant 1.000000e+00 : f32
    %144 = vector.broadcast %cst_25 : f32 to vector<2x256xf32>
    %145 = arith.divf %144, %143 : vector<2x256xf32>
    %c0_26 = arith.constant 0 : index
    %c0_27 = arith.constant 0 : index
    %c0_28 = arith.constant 0 : index
    %146 = vector.load %arg4[%c0_26, %c0_27, %c0_28] : memref<2x1x256xf32, #tpu.memory_space<vmem>>, vector<2x1x256xf32>
    %147 = vector.shape_cast %146 : vector<2x1x256xf32> to vector<2x256xf32>
    %148 = vector.shape_cast %145 : vector<2x256xf32> to vector<2x1x256xf32>
    tpu.vector_store %arg4[%c0_26, %c0_27, %c0_28], %148 {strides = array<i32>} : memref<2x1x256xf32, #tpu.memory_space<vmem>>, vector<2x1x256xf32>,
    return
  }
  func.func @transform_0(%arg0: i32, %arg1: i32) -> (i32, i32) {
    %c0_i32 = arith.constant 0 : i32
    %c0_i32_0 = arith.constant 0 : i32
    %c0_i32_1 = arith.constant 0 : i32
    return %c0_i32, %c0_i32_0 : i32, i32
  }
  func.func @transform_1(%arg0: i32, %arg1: i32) -> (i32, i32, i32) {
    %c0_i32 = arith.constant 0 : i32
    %c0_i32_0 = arith.constant 0 : i32
    return %arg0, %arg1, %c0_i32 : i32, i32, i32
  }
  func.func @transform_2(%arg0: i32, %arg1: i32) -> (i32, i32, i32) {
    %c0_i32 = arith.constant 0 : i32
    %c0_i32_0 = arith.constant 0 : i32
    %c0_i32_1 = arith.constant 0 : i32
    return %arg0, %c0_i32, %c0_i32_0 : i32, i32, i32
  }
}

</mosaic_0001>

<bundles_post_ra>
// kernel: tpu_custom_call.1
= control target key start
LH: loop header
LB: loop body
LE: loop exit
PB: predicated region body
PF: predicated region fallthrough
CT: control target
= control target key end

     0   :  { %7 = vsyncpa [#allocation3], 0  ;;  %s844_s0 = inlined_call_operand.hbm [shape: f32[18,256], index: 0, kind: input, shape index: {}]   ;;  %s845_s1 = inlined_call_operand.hbm [shape: f32[2,4,256], index: 1, kind: input, shape index: {}]   ;;  %s846_s2 = inlined_call_operand.hbm [shape: f32[2,1,256], index: 2, kind: output, shape index: {}]  }
   0x1   :  { %8 = vsyncpa [#allocation6], 0 }
   0x2   :  { %9 = vsyncpa [#allocation4], 0  ;;  %s14_s11 = sshll.u32 %s844_s0, 4  ;;  %s692_s12 = smov [#allocation2]   ;;  %s15_s11 = int_to_ptr.hbm [resolvable:$true] %s14_s11 }
   0x3   :  { %s16_s13 = sshll.u32 %s692_s12, 4  ;;  %s27_s16 = sshll.u32 %s845_s1, 4  ;;  %s17_s13 = int_to_ptr.vmem [resolvable:$true] %s16_s13  ;;  %s28_s16 = int_to_ptr.hbm [resolvable:$true] %s27_s16 }
   0x4   :  { %s693_s17 = smov 256   ;;  %s694_s18 = smov 16  }
   0x5   :  { %22 = dma.hbm_to_vmem [thread:$0]  %s15_s11, 768, %s17_s13, [#allocation3], %s693_s17, %s693_s17, %s694_s18  }
   0x6   :  { %s695_s19 = smov [#allocation5]   ;;  %s696_s21 = smov 128  }
   0x7   :  { %s29_s20 = sshll.u32 %s695_s19, 4  ;;  %s697_s22 = smov 8   ;;  %s30_s20 = int_to_ptr.vmem [resolvable:$true] %s29_s20 }
   0x8   :  { %35 = dma.hbm_to_vmem [thread:$0]  %s28_s16, 256, %s30_s20, [#allocation6], %s696_s21, %s696_s21, %s697_s22  }
   0x9   :  { %686 = dma.done.wait [#allocation3], 768  }
   0xa   :  { %687 = vsyncadd [#allocation3], 4294966528 }
   0xb   :  { %688 = dma.done.wait [#allocation6], 256  }
   0xc   :  { %689 = vsyncadd [#allocation6], 4294967040  ;;  %v44_v0 = vld [vmem:[#allocation5] sm:$0xff]  ;;  %v45_v1 = vld [vmem:[#allocation5 + $0x8] sm:$0xff]  ;;  %vm59_vm0 = vcmask 1043456   ;;  %vm132_vm1 = vcmask 1041409  }
   0xd   :  { %48 = vst [vmem:[#allocation1] ss:$2 sm:$0xff] %v44_v0  ;;  %s698_s0 = smov 17   ;;  %s699_s1 = smov 15   ;;  %vm154_vm2 = vcmask 138240   ;;  %vm194_vm3 = vcmask 130048  }
   0xe   :  { %52 = vst [vmem:[#allocation1 + $0x10] ss:$2 sm:$0xff] %v45_v1  ;;  %s700_s23 = smov 1   ;;  %s701_s24 = smov 127   ;;  %vm235_vm4 = vcmask 121856   ;;  %vm276_vm5 = vcmask 7168  }
   0xf   :  { %s702_s25 = smov 113   ;;  %s703_s26 = smov 112   ;;  %vm361_vm6 = vcmask 1039360   ;;  %vm402_vm7 = vcmask 924672   ;;  %vm443_vm8 = vcmask 916480   ;;  %vm484_vm9 = vcmask 908288  }
  0x10   :  { %s704_s27 = smov 111   ;;  %s705_s28 = smov [#allocation7]  }
  0x11   :  { %s574_s29 = sshll.u32 %s705_s28, 4  ;;  %s576_s4 = sshll.u32 %s846_s2, 4  ;;  %s575_s29 = int_to_ptr.vmem [resolvable:$true] %s574_s29  ;;  %s577_s4 = int_to_ptr.hbm [resolvable:$true] %s576_s4 }
  0x12   :  { %s706_s5 = smov 32   ;;  %s707_s6 = smov 2  }
  0x14   :  { %v50_v2 = vld.sshfl [vmem:[#allocation1 + $0x8] sm:$0xff pattern:$0x75316420]  ;;  %v49_v3 = vld.sshfl [vmem:[#allocation1] sm:$0xff pattern:$0x75316420] }
  0x15   :  { %v54_v4 = vld.sshfl [vmem:[#allocation1 + $0x18] sm:$0xff pattern:$0x75316420]  ;;  %v67_v5 = vsel %vm59_vm0, %v50_v2, 0.0  ;;  %v60_v6 = vsel %vm59_vm0, %v49_v3, 0.0 }
  0x16   :  { %v68_v7 = vrot.slane %v67_v5, 4  ;;  %v81_v8 = vsel %vm59_vm0, %v54_v4, 0.0  ;;  %v53_v9 = vld.sshfl [vmem:[#allocation1 + $0x10] sm:$0xff pattern:$0x75316420]  ;;  %v61_v10 = vrot.slane %v60_v6, 4 }
  0x17   :  { %v82_v11 = vrot.slane %v81_v8, 4  ;;  %v74_v12 = vsel %vm59_vm0, %v53_v9, 0.0  ;;  %88 = vst [vmem:[#allocation1] ss:$2 sm:$0xff] %v44_v0 }
  0x18   :  { %v69_v13 = vadd.f32 %v68_v7, %v67_v5  ;;  %v62_v14 = vadd.f32 %v61_v10, %v60_v6  ;;  %v75_v15 = vrot.slane %v74_v12, 4  ;;  %92 = vst [vmem:[#allocation1 + $0x10] ss:$2 sm:$0xff] %v45_v1 }
  0x19   :  { %v83_v16 = vadd.f32 %v82_v11, %v81_v8 }
  0x1a   :  { %v70_v17 = vrot.slane %v69_v13, 2  ;;  %v63_v18 = vrot.slane %v62_v14, 2  ;;  %v76_v19 = vadd.f32 %v75_v15, %v74_v12 }
  0x1b   :  { %v84_v20 = vrot.slane %v83_v16, 2 }
  0x1c   :  { %v71_v21 = vadd.f32 %v70_v17, %v69_v13  ;;  %v64_v22 = vadd.f32 %v63_v18, %v62_v14  ;;  %v77_v23 = vrot.slane %v76_v19, 2 }
  0x1d   :  { %v85_v24 = vadd.f32 %v84_v20, %v83_v16  ;;  %v165_v20 = vld [vmem:[#allocation2 + $0x11] ss:$8 sm:$0x3] }
  0x1e   :  { %v72_v25 = vrot.slane %v71_v21, 1  ;;  %v65_v26 = vrot.slane %v64_v22, 1  ;;  %v78_v27 = vadd.f32 %v77_v23, %v76_v19  ;;  %v90_v28 = vld.sshfl [vmem:[#allocation1 + $0x8] sm:$0xff pattern:$0x75316420]  ;;  %v176_v23 = vperm.slane %v165_v20, 0 }
  0x1f   :  { %v86_v29 = vrot.slane %v85_v24, 1  ;;  %v94_v30 = vld.sshfl [vmem:[#allocation1 + $0x18] sm:$0xff pattern:$0x75316420]  ;;  %v106_v32 = vsel %vm59_vm0, %v90_v28, -inf }
  0x20   :  { %v79_v31 = vrot.slane %v78_v27, 1  ;;  %v89_v33 = vld.sshfl [vmem:[#allocation1] sm:$0xff pattern:$0x75316420]  ;;  %v735_v34 = vadd.f32 %v72_v25, %v71_v21  ;;  %v120_v36 = vsel %vm59_vm0, %v94_v30, -inf  ;;  %v741_v39 = vadd.f32 %v65_v26, %v64_v22 }
  0x21   :  { %v737_v35 = vadd.f32 %v86_v29, %v85_v24  ;;  %v93_v37 = vld.sshfl [vmem:[#allocation1 + $0x10] sm:$0xff pattern:$0x75316420]  ;;  %v99_v38 = vsel %vm59_vm0, %v89_v33, -inf  ;;  %v121_v41 = vrot.slane %v120_v36, 4  ;;  %v107_v43 = vrot.slane %v106_v32, 4 }
  0x22   :  { %v743_v40 = vadd.f32 %v79_v31, %v78_v27  ;;  %v113_v44 = vsel %vm59_vm0, %v93_v37, -inf  ;;  %v100_v47 = vrot.slane %v99_v38, 4  ;;  %v163_v21 = vld [vmem:[#allocation2] ss:$8 sm:$0x3]  ;;  %v177_v24 = vperm.slane %v165_v20, 1 }
  0x23   :  { %v131_v42 = vrot.slane %v737_v35, 7  ;;  %v122_v46 = vmax.f32 %v120_v36, %v121_v41  ;;  %v114_v49 = vrot.slane %v113_v44, 4  ;;  %v108_v51 = vmax.f32 %v106_v32, %v107_v43  ;;  %v204_v29 = vld [vmem:[#allocation2 + $0x1] ss:$8 sm:$0x3] }
  0x24   :  { %v146_v45 = vrot.slane %v743_v40, 7  ;;  %v101_v54 = vmax.f32 %v99_v38, %v100_v47  ;;  %v167_v30 = vperm.slane %v163_v21, 0  ;;  %v168_v31 = vperm.slane %v163_v21, 1  ;;  %v206_v36 = vld [vmem:[#allocation2 + $0x12] ss:$8 sm:$0x3] }
  0x25   :  { %v133_v48 = vsel %vm132_vm1, %v131_v42, %v735_v34  ;;  %v123_v52 = vrot.slane %v122_v46, 2  ;;  %v115_v53 = vmax.f32 %v113_v44, %v114_v49  ;;  %v109_v56 = vrot.slane %v108_v51, 2 }
  0x26   :  { %136 = vrot.lane.b32.xlu0 %v133_v48, %s698_s0  ;;  %v147_v50 = vsel %vm132_vm1, %v146_v45, %v741_v39  ;;  %184 = vrot.lane.b32.xlu2 %v133_v48, %s694_s18  ;;  %v102_v58 = vrot.slane %v101_v54, 2  ;;  %v208_v41 = vperm.slane %v204_v29, 0  ;;  %v209_v42 = vperm.slane %v204_v29, 1 }
  0x27   :  { %150 = vrot.lane.b32.xlu1 %v147_v50, %s698_s0  ;;  %v116_v55 = vrot.slane %v115_v53, 2  ;;  %v124_v57 = vmax.f32 %v122_v46, %v123_v52  ;;  %v110_v60 = vmax.f32 %v108_v51, %v109_v56  ;;  %v217_v45 = vperm.slane %v206_v36, 0 }
  0x28   :  { %v103_v62 = vmax.f32 %v101_v54, %v102_v58  ;;  %v218_v46 = vperm.slane %v206_v36, 1 }
  0x29   :  { %v117_v59 = vmax.f32 %v115_v53, %v116_v55  ;;  %v125_v61 = vrot.slane %v124_v57, 1  ;;  %v111_v0 = vrot.slane %v110_v60, 1  ;;  %v245_v53 = vld [vmem:[#allocation2 + $0x2] ss:$8 sm:$0x3] }
  0x2a   :  { %v104_v2 = vrot.slane %v103_v62, 1 }
  0x2b   :  { %v118_v63 = vrot.slane %v117_v59, 1  ;;  %v757_v1 = vmax.f32 %v124_v57, %v125_v61  ;;  %v762_v4 = vmax.f32 %v110_v60, %v111_v0  ;;  %v247_v61 = vld [vmem:[#allocation2 + $0x13] ss:$8 sm:$0x3] }
  0x2c   :  { %v765_v6 = vmax.f32 %v103_v62, %v104_v2  ;;  %v249_v62 = vperm.slane %v245_v53, 0 }
  0x2d   :  { %v759_v3 = vmax.f32 %v117_v59, %v118_v63  ;;  %v134_v5 = vrot.slane %v757_v1, 7  ;;  %v250_v63 = vperm.slane %v245_v53, 1 }
  0x2e   :  { %231 = vrot.lane.b32.xlu0 %v147_v50, %s699_s1  ;;  %190 = vrot.lane.b32.xlu2 %v147_v50, %s694_s18 }
  0x2f   :  { %272 = vrot.lane.b32.xlu1 %v147_v50, %s700_s23  ;;  %v148_v7 = vrot.slane %v759_v3, 7  ;;  %v135_v8 = vsel %vm132_vm1, %v134_v5, %v762_v4 }
  0x31   :  { %v149_v9 = vsel %vm132_vm1, %v148_v7, %v765_v6 }
  0x36   :  { %266 = vrot.lane.b32.xlu0 %v133_v48, %s700_s23  ;;  %225 = vrot.lane.b32.xlu2 %v133_v48, %s699_s1 }
  0x37   :  { %353 = vrot.lane.b32.xlu1 %v147_v50, %s701_s24 }
  0x3e   :  { %138 = vrot.lane.b32.xlu0 %v135_v8, %s698_s0  ;;  %355 = vrot.lane.b32.xlu2 %v133_v48, %s701_s24 }
  0x3f   :  { %152 = vrot.lane.b32.xlu1 %v149_v9, %s698_s0 }
  0x46   :  { %186 = vrot.lane.b32.xlu0 %v135_v8, %s694_s18  ;;  %233 = vrot.lane.b32.xlu2 %v149_v9, %s699_s1 }
  0x47   :  { %192 = vrot.lane.b32.xlu1 %v149_v9, %s694_s18 }
  0x4e   :  { %274 = vrot.lane.b32.xlu0 %v149_v9, %s700_s23  ;;  %268 = vrot.lane.b32.xlu2 %v135_v8, %s700_s23 }
  0x4f   :  { %227 = vrot.lane.b32.xlu1 %v135_v8, %s699_s1 }
  0x56   :  { %357 = vrot.lane.b32.xlu0 %v149_v9, %s701_s24  ;;  %394 = vrot.lane.b32.xlu2 %v147_v50, %s702_s25 }
  0x57   :  { %359 = vrot.lane.b32.xlu1 %v135_v8, %s701_s24 }
  0x5e   :  { %396 = vrot.lane.b32.xlu0 %v133_v48, %s702_s25  ;;  %400 = vrot.lane.b32.xlu2 %v135_v8, %s702_s25 }
  0x5f   :  { %398 = vrot.lane.b32.xlu1 %v149_v9, %s702_s25 }
  0x66   :  { %435 = vrot.lane.b32.xlu0 %v147_v50, %s703_s26  ;;  %439 = vrot.lane.b32.xlu2 %v149_v9, %s703_s26 }
  0x67   :  { %437 = vrot.lane.b32.xlu1 %v133_v48, %s703_s26 }
  0x6e   :  { %441 = vrot.lane.b32.xlu0 %v135_v8, %s703_s26  ;;  %478 = vrot.lane.b32.xlu2 %v133_v48, %s704_s27 }
  0x6f   :  { %476 = vrot.lane.b32.xlu1 %v147_v50, %s704_s27 }
  0x76   :  { %480 = vrot.lane.b32.xlu0 %v149_v9, %s704_s27  ;;  %v286_v9 = vld [vmem:[#allocation2 + $0x3] ss:$8 sm:$0x3] }
  0x77   :  { %482 = vrot.lane.b32.xlu1 %v135_v8, %s704_s27  ;;  %v308_v8 = vld [vmem:[#allocation2 + $0x4] ss:$8 sm:$0x3] }
  0x80   :  { %v185_v10 = vpop.permute.xlu2 %184 }
  0x88   :  { %v191_v11 = vpop.permute.xlu2 %190 }
  0x89   :  { %v195_v47 = vsel %vm194_vm3, %v191_v11, %v185_v10  ;;  %v201_v48 = vsel %vm194_vm3, %v185_v10, %v191_v11 }
  0x8a   :  { %v212_v56 = vmul.f32 %v208_v41, %v201_v48  ;;  %v213_v57 = vmul.f32 %v209_v42, %v195_v47 }
  0x90   :  { %v226_v14 = vpop.permute.xlu2 %225 }
  0x98   :  { %v137_v12 = vpop.permute.xlu0 %136  ;;  %v782_v18 = vpop.permute.xlu2 %355 }
  0x99   :  { %v151_v13 = vpop.permute.xlu1 %150 }
  0x9a   :  { %v155_v32 = vsel %vm154_vm2, %v151_v13, %v137_v12  ;;  %v161_v33 = vsel %vm154_vm2, %v137_v12, %v151_v13  ;;  %v258_v12 = vperm.slane %v247_v61, 0  ;;  %v259_v13 = vperm.slane %v247_v61, 1 }
  0x9b   :  { %v171_v43 = vmul.f32 %v167_v30, %v161_v33  ;;  %v172_v44 = vmul.f32 %v168_v31, %v155_v32  ;;  %v310_v33 = vld [vmem:[#allocation2 + $0x15] ss:$8 sm:$0x3] }
  0xa0   :  { %v232_v15 = vpop.permute.xlu0 %231  ;;  %v234_v26 = vpop.permute.xlu2 %233 }
  0xa1   :  { %v778_v16 = vpop.permute.xlu1 %272  ;;  %v236_v5 = vsel %vm235_vm4, %v232_v15, %v226_v14  ;;  %v242_v7 = vsel %vm235_vm4, %v226_v14, %v232_v15 }
  0xa2   :  { %v253_v21 = vmul.f32 %v249_v62, %v242_v7  ;;  %v373_v7 = vld [vmem:[#allocation2 + $0x5] ss:$8 sm:$0x3] }
  0xa8   :  { %v780_v17 = vpop.permute.xlu0 %266  ;;  %v269_v60 = vpop.permute.xlu2 %268 }
  0xa9   :  { %v784_v19 = vpop.permute.xlu1 %353  ;;  %v277_v36 = vsel %vm276_vm5, %v778_v16, %v780_v17 }
  0xb0   :  { %v139_v22 = vpop.permute.xlu0 %138 }
  0xb1   :  { %v153_v25 = vpop.permute.xlu1 %152 }
  0xb2   :  { %v156_v27 = vsel %vm154_vm2, %v153_v25, %v139_v22  ;;  %v162_v28 = vsel %vm154_vm2, %v139_v22, %v153_v25  ;;  %v254_v22 = vmul.f32 %v250_v63, %v236_v5  ;;  %v313_v25 = vperm.slane %v308_v8, 1 }
  0xb3   :  { %v180_v37 = vmul.f32 %v176_v23, %v162_v28  ;;  %v181_v38 = vmul.f32 %v177_v24, %v156_v27  ;;  %v312_v24 = vperm.slane %v308_v8, 0  ;;  %v290_v27 = vperm.slane %v286_v9, 0 }
  0xb4   :  { %v291_v28 = vperm.slane %v286_v9, 1  ;;  %vm558_vm2 = vcmask 1040384  }
  0xb5   :  { %v182_v50 = vadd.f32 %v180_v37, %v171_v43  ;;  %v183_v51 = vadd.f32 %v181_v38, %v172_v44  ;;  %v283_v37 = vsel %vm276_vm5, %v780_v17, %v778_v16  ;;  %v288_v38 = vld [vmem:[#allocation2 + $0x14] ss:$8 sm:$0x3]  ;;  %v395_v43 = vpop.permute.xlu2 %394  ;;  %v318_v44 = vmul.f32 %v312_v24, %v743_v40 }
  0xb6   :  { %v294_v47 = vmul.f32 %v290_v27, %v283_v37  ;;  %v295_v48 = vmul.f32 %v291_v28, %v277_v36  ;;  %v316_v16 = vmul.f32 %v312_v24, %v741_v39  ;;  %v317_v17 = vmul.f32 %v313_v25, %v735_v34 }
  0xb7   :  { %v214_v0 = vadd.f32 %v212_v56, %v182_v50  ;;  %v215_v2 = vadd.f32 %v213_v57, %v183_v51  ;;  %v300_v50 = vperm.slane %v288_v38, 1  ;;  %v324_v40 = vrot.slane %v318_v44, 7 }
  0xb8   :  { %v187_v49 = vpop.permute.xlu0 %186 }
  0xb9   :  { %v193_v52 = vpop.permute.xlu1 %192 }
  0xba   :  { %v196_v54 = vsel %vm194_vm3, %v193_v52, %v187_v49  ;;  %v202_v55 = vsel %vm194_vm3, %v187_v49, %v193_v52  ;;  %v299_v49 = vperm.slane %v288_v38, 0 }
  0xbb   :  { %v221_v58 = vmul.f32 %v217_v45, %v202_v55  ;;  %v222_v59 = vmul.f32 %v218_v46, %v196_v54  ;;  %v333_v45 = vperm.slane %v310_v33, 0  ;;  %v334_v46 = vperm.slane %v310_v33, 1 }
  0xbd   :  { %v223_v10 = vadd.f32 %v221_v58, %v214_v0  ;;  %v224_v11 = vadd.f32 %v222_v59, %v215_v2  ;;  %v339_v57 = vmul.f32 %v333_v45, %v759_v3  ;;  %v340_v58 = vmul.f32 %v334_v46, %v757_v1  ;;  %v401_v8 = vpop.permute.xlu2 %400 }
  0xbe   :  { %v337_v39 = vmul.f32 %v333_v45, %v765_v6  ;;  %v338_v34 = vmul.f32 %v334_v46, %v762_v4  ;;  %v362_v6 = vsel %vm361_vm6, %v784_v19, %v782_v18  ;;  %v375_v4 = vld [vmem:[#allocation2 + $0x16] ss:$8 sm:$0x3] }
  0xbf   :  { %v255_v14 = vadd.f32 %v253_v21, %v223_v10  ;;  %v256_v15 = vadd.f32 %v254_v22, %v224_v11  ;;  %v345_v2 = vrot.slane %v339_v57, 7  ;;  %v347_v5 = vrot.slane %v340_v58, 7  ;;  %v414_v22 = vld [vmem:[#allocation2 + $0x6] ss:$8 sm:$0x3] }
  0xc0   :  { %v275_v20 = vpop.permute.xlu0 %274  ;;  %v377_v11 = vperm.slane %v373_v7, 0  ;;  %v370_v21 = vsel %vm361_vm6, %v782_v18, %v784_v19  ;;  %v386_v27 = vperm.slane %v375_v4, 0 }
  0xc1   :  { %v228_v23 = vpop.permute.xlu1 %227  ;;  %v278_v51 = vsel %vm276_vm5, %v275_v20, %v269_v60  ;;  %v284_v52 = vsel %vm276_vm5, %v269_v60, %v275_v20  ;;  %v325_v60 = vsel %vm132_vm1, %v324_v40, %v316_v16  ;;  %v378_v20 = vperm.slane %v373_v7, 1 }
  0xc2   :  { %v237_v29 = vsel %vm235_vm4, %v234_v26, %v228_v23  ;;  %v243_v30 = vsel %vm235_vm4, %v228_v23, %v234_v26  ;;  %v319_v26 = vmul.f32 %v313_v25, %v737_v35  ;;  %v303_v59 = vmul.f32 %v299_v49, %v284_v52 }
  0xc3   :  { %v262_v31 = vmul.f32 %v258_v12, %v243_v30  ;;  %v263_v32 = vmul.f32 %v259_v13, %v237_v29  ;;  %v304_v61 = vmul.f32 %v300_v50, %v278_v51  ;;  %v346_v12 = vsel %vm132_vm1, %v345_v2, %v337_v39  ;;  %v457_v51 = vld [vmem:[#allocation2 + $0x20] ss:$8 sm:$0x3]  ;;  %v496_v39 = vld [vmem:[#allocation2 + $0x10] ss:$8 sm:$0x3] }
  0xc4   :  { %v326_v56 = vrot.slane %v319_v26, 7  ;;  %v348_v13 = vsel %vm132_vm1, %v347_v5, %v338_v34  ;;  %v381_v25 = vmul.f32 %v377_v11, %v362_v6  ;;  %v382_v28 = vmul.f32 %v378_v20, %v370_v21 }
  0xc5   :  { %v264_v41 = vadd.f32 %v262_v31, %v255_v14  ;;  %v265_v42 = vadd.f32 %v263_v32, %v256_v15  ;;  %v387_v29 = vperm.slane %v375_v4, 1  ;;  %v418_v30 = vperm.slane %v414_v22, 0  ;;  %v416_v15 = vld [vmem:[#allocation2 + $0x17] ss:$8 sm:$0x3]  ;;  %v440_v38 = vpop.permute.xlu2 %439 }
  0xc6   :  { %v327_v0 = vsel %vm132_vm1, %v326_v56, %v317_v17  ;;  %v419_v14 = vperm.slane %v414_v22, 1  ;;  %v427_v44 = vperm.slane %v416_v15, 0  ;;  %v468_v56 = vperm.slane %v457_v51, 0 }
  0xc7   :  { %v296_v54 = vadd.f32 %v294_v47, %v264_v41  ;;  %v297_v55 = vadd.f32 %v295_v48, %v265_v42  ;;  %v455_v41 = vld [vmem:[#allocation2 + $0x7] ss:$8 sm:$0x3]  ;;  %v428_v48 = vperm.slane %v416_v15, 1  ;;  %v501_v11 = vperm.slane %v496_v39, 1 }
  0xc8   :  { %v358_v53 = vpop.permute.xlu0 %357  ;;  %v459_v49 = vperm.slane %v455_v41, 0  ;;  %v460_v50 = vperm.slane %v455_v41, 1 }
  0xc9   :  { %v360_v35 = vpop.permute.xlu1 %359  ;;  %v305_v62 = vadd.f32 %v303_v59, %v296_v54  ;;  %v306_v63 = vadd.f32 %v304_v61, %v297_v55 }
  0xca   :  { %v363_v31 = vsel %vm361_vm6, %v358_v53, %v360_v35  ;;  %v371_v32 = vsel %vm361_vm6, %v360_v35, %v358_v53  ;;  %v469_v35 = vperm.slane %v457_v51, 1 }
  0xcb   :  { %v330_v9 = vadd.f32 %v325_v60, %v305_v62  ;;  %v331_v1 = vadd.f32 %v327_v0, %v306_v63  ;;  %v390_v26 = vmul.f32 %v386_v27, %v363_v31  ;;  %v391_v45 = vmul.f32 %v387_v29, %v371_v32 }
  0xcd   :  { %v351_v23 = vadd.f32 %v346_v12, %v330_v9  ;;  %v352_v24 = vadd.f32 %v348_v13, %v331_v1 }
  0xcf   :  { %v383_v19 = vadd.f32 %v381_v25, %v351_v23  ;;  %v384_v37 = vadd.f32 %v382_v28, %v352_v24 }
  0xd0   :  { %v397_v3 = vpop.permute.xlu0 %396 }
  0xd1   :  { %v399_v10 = vpop.permute.xlu1 %398  ;;  %v403_v33 = vsel %vm402_vm7, %v395_v43, %v397_v3  ;;  %v411_v36 = vsel %vm402_vm7, %v397_v3, %v395_v43  ;;  %v392_v52 = vadd.f32 %v390_v26, %v383_v19  ;;  %v393_v53 = vadd.f32 %v391_v45, %v384_v37  ;;  %v498_v3 = vld [vmem:[#allocation2 + $0x21] ss:$8 sm:$0x3] }
  0xd2   :  { %v422_v46 = vmul.f32 %v418_v30, %v403_v33  ;;  %v423_v47 = vmul.f32 %v419_v14, %v411_v36  ;;  %v404_v43 = vsel %vm402_vm7, %v399_v10, %v401_v8  ;;  %v412_v16 = vsel %vm402_vm7, %v401_v8, %v399_v10  ;;  %v479_v8 = vpop.permute.xlu2 %478 }
  0xd3   :  { %v431_v57 = vmul.f32 %v427_v44, %v404_v43  ;;  %v432_v58 = vmul.f32 %v428_v48, %v412_v16  ;;  %v500_v10 = vperm.slane %v496_v39, 0  ;;  %v509_v4 = vperm.slane %v498_v3, 0 }
  0xd4   :  { %v424_v55 = vadd.f32 %v422_v46, %v392_v52  ;;  %v425_v40 = vadd.f32 %v423_v47, %v393_v53  ;;  %v510_v21 = vperm.slane %v498_v3, 1 }
  0xd6   :  { %v433_v34 = vadd.f32 %v431_v57, %v424_v55  ;;  %v434_v2 = vadd.f32 %v432_v58, %v425_v40  ;;  %v564_v55 = vlaneseq }
  0xd8   :  { %v436_v18 = vpop.permute.xlu0 %435  ;;  %vm566_vm4 = vcmp.lt.s32.totalorder %v564_v55, 256 }
  0xd9   :  { %v438_v42 = vpop.permute.xlu1 %437 }
  0xda   :  { %v444_v17 = vsel %vm443_vm8, %v436_v18, %v438_v42  ;;  %v452_v54 = vsel %vm443_vm8, %v438_v42, %v436_v18 }
  0xdb   :  { %v463_v61 = vmul.f32 %v459_v49, %v444_v17  ;;  %v464_v62 = vmul.f32 %v460_v50, %v452_v54 }
  0xdd   :  { %v465_v9 = vadd.f32 %v463_v61, %v433_v34  ;;  %v466_v1 = vadd.f32 %v464_v62, %v434_v2 }
  0xe0   :  { %v442_v59 = vpop.permute.xlu0 %441 }
  0xe1   :  { %v445_v63 = vsel %vm443_vm8, %v440_v38, %v442_v59  ;;  %v453_v60 = vsel %vm443_vm8, %v442_v59, %v440_v38  ;;  %v477_v0 = vpop.permute.xlu1 %476 }
  0xe2   :  { %v472_v5 = vmul.f32 %v468_v56, %v445_v63  ;;  %v473_v7 = vmul.f32 %v469_v35, %v453_v60  ;;  %v485_v12 = vsel %vm484_vm9, %v477_v0, %v479_v8  ;;  %v493_v13 = vsel %vm484_vm9, %v479_v8, %v477_v0 }
  0xe3   :  { %v504_v23 = vmul.f32 %v500_v10, %v485_v12  ;;  %v505_v24 = vmul.f32 %v501_v11, %v493_v13 }
  0xe4   :  { %v474_v20 = vadd.f32 %v472_v5, %v465_v9  ;;  %v475_v6 = vadd.f32 %v473_v7, %v466_v1 }
  0xe6   :  { %v506_v29 = vadd.f32 %v504_v23, %v474_v20  ;;  %v507_v30 = vadd.f32 %v505_v24, %v475_v6 }
  0xe8   :  { %v481_v22 = vpop.permute.xlu0 %480 }
  0xe9   :  { %v483_v25 = vpop.permute.xlu1 %482 }
  0xea   :  { %v486_v27 = vsel %vm484_vm9, %v481_v22, %v483_v25  ;;  %v494_v28 = vsel %vm484_vm9, %v483_v25, %v481_v22 }
  0xeb   :  { %v513_v14 = vmul.f32 %v509_v4, %v486_v27  ;;  %v514_v15 = vmul.f32 %v510_v21, %v494_v28 }
  0xed   :  { %v515_v31 = vadd.f32 %v513_v14, %v506_v29  ;;  %v516_v32 = vadd.f32 %v514_v15, %v507_v30 }
  0xef   :  { %v517_v33 = vsub.f32 0.0, %v515_v31  ;;  %v518_v36 = vsub.f32 0.0, %v516_v32 }
  0xf1   :  { %v519_v18 = vmul.f32 1.442695, %v517_v33  ;;  %v521_v19 = vmul.f32 1.442695, %v518_v36 }
  0xf3   :  { %606 = vpow2.f32 %v519_v18 }
  0xf4   :  { %608 = vpow2.f32 %v521_v19 }
  0xf9   :  { %v607_v37 = vpop.eup %606 }
  0xfa   :  { %v609_v38 = vpop.eup %608  ;;  %v523_v41 = vadd.f32 1.0, %v607_v37 }
  0xfb   :  { %v524_v42 = vadd.f32 1.0, %v609_v38 }
  0xfc   :  { %610 = vrcp.f32 %v523_v41  ;;  %vm530_vm12 = vweird.f32 %v523_v41  ;;  %v536_v53 = vand.u32 2147483648, %v523_v41  ;;  %v534_v54 = vand.u32 2147483647, %v523_v41 }
  0xfd   :  { %612 = vrcp.f32 %v524_v42  ;;  %v551_v50 = vand.u32 2147483648, %v524_v42  ;;  %v549_v52 = vand.u32 2147483647, %v524_v42  ;;  %vm545_vm13 = vweird.f32 %v524_v42 }
  0xfe   :  { %v537_v57 = vor.u32 1.1754944e-38, %v536_v53  ;;  %vm535_vm3 = vcmp.eq.f32.partialorder %v534_v54, 8.507059e+37 }
  0xff   :  { %v552_v40 = vor.u32 1.1754944e-38, %v551_v50  ;;  %vm550_vm0 = vcmp.eq.f32.partialorder %v549_v52, 8.507059e+37 }
 0x102   :  { %v611_v44 = vpop.eup %610 }
 0x103   :  { %v613_v26 = vpop.eup %612  ;;  %v526_v45 = vmul.f32 %v611_v44, %v523_v41  ;;  %vm531_vm10 = vweird.f32 %v611_v44 }
 0x104   :  { %v541_v46 = vmul.f32 %v613_v26, %v524_v42  ;;  %vm546_vm11 = vweird.f32 %v613_v26  ;;  %vm834_vm14 = vmor %vm530_vm12, %vm531_vm10 }
 0x105   :  { %v527_v47 = vsub.f32 1.0, %v526_v45  ;;  %vm547_vm15 = vmor %vm545_vm13, %vm546_vm11 }
 0x106   :  { %v542_v48 = vsub.f32 1.0, %v541_v46 }
 0x107   :  { %v528_v49 = vmul.f32 %v611_v44, %v527_v47 }
 0x108   :  { %v543_v51 = vmul.f32 %v613_v26, %v542_v48 }
 0x109   :  { %v529_v43 = vadd.f32 %v611_v44, %v528_v49 }
 0x10a   :  { %v544_v16 = vadd.f32 %v613_v26, %v543_v51 }
 0x10b   :  { %v533_v56 = vsel %vm834_vm14, %v611_v44, %v529_v43 }
 0x10c   :  { %v548_v35 = vsel %vm547_vm15, %v613_v26, %v544_v16  ;;  %v538_v61 = vsel %vm535_vm3, %v537_v57, %v533_v56 }
 0x10d   :  { %v553_v58 = vsel %vm550_vm0, %v552_v40, %v548_v35 }
 0x10e   :  { %v557_v59 = vrot.slane %v553_v58, 7 }
 0x110   :  { %v559_v62 = vsel %vm558_vm2, %v538_v61, %v557_v59  ;;  %v560_v63 = vsel %vm132_vm1, %v538_v61, %v557_v59 }
 0x111   :  { %v561_v60 = vrot.slane %v560_v63, 1  ;;  %568 = vst.msk [vmem:[#allocation7] sm:$0x3] %vm566_vm4, %v559_v62 }
 0x113   :  { %569 = vst.msk [vmem:[#allocation7 + $0x2] sm:$0x3] %vm566_vm4, %v561_v60 }
 0x114   :  { %582 = dma.vmem_to_hbm [thread:$0]  %s575_s29, 64, %s577_s4, [#allocation4], %s706_s5, %s706_s5, %s707_s6  }
 0x115   :  { %690 = dma.done.wait [#allocation4], 64  }
 0x116   :  { %691 = vsyncadd [#allocation4], 4294967232 }
 0x117   :  { %587 = vsyncpa [#allocation3], 1 }
 0x118   :  { %588 = vsyncpa [#allocation6], 1 }
 0x119   :  { %589 = vsyncpa [#allocation4], 1 }

</bundles_post_ra>
